<compile_context>
chip_gen: v7x
topology: tpu7x:2x2x1
jax: 0.10.0
libtpu: 0.0.40
codegen_flags: <defaults>
</compile_context>

<pallas_src>
import functools

import jax
import jax.numpy as jnp
from jax import lax
from jax.experimental import pallas as pl
from jax.experimental.pallas import tpu as pltpu


def _self_attn_kernel(x_ref, w_ref, o_ref, qkv_ref, *, num_heads, compute_dtype):
    # Blocks:
    #   x_ref   : [1, N, C]   (batch b)
    #   w_ref   : [C, 3C]     fused qkv weight, x @ W^T layout, compute_dtype,
    #                         VMEM-resident & single-buffered across the grid
    #   o_ref   : [1, N, C]   merged-head output block
    #   qkv_ref : [N, 3C]     VMEM scratch holding the projection result
    _, N, C = x_ref.shape
    H = num_heads
    d = C // H

    x = x_ref[0].astype(compute_dtype)       # [N, C]
    w = w_ref[...]                            # [C, 3C], already compute_dtype

    # One full-width projection on the MXU (f32 accumulation), parked in VMEM
    # scratch so per-head reads are cheap static ref slices (no value relayout).
    qkv_ref[...] = jnp.dot(
        x, w, preferred_element_type=jnp.float32).astype(compute_dtype)

    for h in range(H):                        # static loop; see header note
        q0 = 0 * C + h * d
        k0 = 1 * C + h * d
        v0 = 2 * C + h * d
        qh = qkv_ref[:, q0:q0 + d]            # [N, d]  static ref slices
        kh = qkv_ref[:, k0:k0 + d]            # [N, d]
        vh = qkv_ref[:, v0:v0 + d]            # [N, d]

        # attn = q @ k^T without materializing k.T: contract d of both operands.
        attn = lax.dot_general(
            qh, kh, (((1,), (1,)), ((), ())),
            preferred_element_type=jnp.float32)                 # [N, N] f32

        oh = jnp.dot(attn.astype(compute_dtype), vh,
                     preferred_element_type=jnp.float32)        # [N, d] f32

        # Store this head immediately into its channel slice of the output
        # block (VMEM partial store); the HBM writeback of the whole block is
        # lane-dense.  Bounds the live range of per-head temporaries.
        o_ref[0, :, h * d:(h + 1) * d] = oh.astype(o_ref.dtype)


def prepare_qkv_weight(qkv_weight, dtype=jnp.bfloat16):
    """PyTorch Linear stores W as [out=3C, in=C]; Linear(x) = x @ W^T.

    Transposes to [C, 3C] and casts to the kernel compute dtype.  Call once at
    model init (hoisted out of the per-forward hot path).
    """
    return jnp.asarray(qkv_weight).T.astype(dtype)              # [C, 3C]


def self_attention_pallas(x, w_qkv, num_heads, compute_dtype=jnp.bfloat16):
    """x: [B, N, C]; w_qkv: [C, 3C] pre-transposed fused qkv weight.

    compute_dtype=bf16 (default) is the fast MXU-input path on v5e/v6e/v7x;
    accumulation stays f32.  Pass compute_dtype=jnp.float32 for exact math.
    """
    B, N, C = x.shape
    H = num_heads
    d = C // H
    assert C % H == 0
    assert w_qkv.shape == (C, 3 * C)

    # No-op if prepare_qkv_weight already produced compute_dtype.
    w_qkv = w_qkv.astype(compute_dtype)

    kernel = functools.partial(
        _self_attn_kernel, num_heads=H, compute_dtype=compute_dtype)

    x_bytes = jnp.dtype(x.dtype).itemsize
    w_bytes = jnp.dtype(compute_dtype).itemsize
    o_bytes = x_bytes

    flops = 2 * B * N * C * (3 * C) + 2 * 2 * B * H * N * N * d
    bytes_accessed = (B * N * C * x_bytes            # x read
                      + C * 3 * C * w_bytes          # weight read (resident)
                      + B * N * C * o_bytes)         # output write

    # VMEM budget: single-buffered resident weight + double-buffered x / o
    # blocks + qkv scratch + one attn tile & per-head f32 temporaries, with
    # ~30% headroom.  Clamped to 64 MiB (physical VMEM on v7x; well within
    # v5e/v6e capacity).
    vmem_needed = (
        C * 3 * C * w_bytes                # weight, Buffered(1)
        + 2 * N * C * x_bytes              # x block double-buffer
        + 2 * N * C * o_bytes              # out block double-buffer
        + N * 3 * C * w_bytes              # qkv scratch
        + N * N * 4 + 3 * N * d * 4        # attn tile + q/k/v head temporaries
    )
    vmem_limit = min(int(vmem_needed * 1.3) + (2 << 20), 64 << 20)

    return pl.pallas_call(
        kernel,
        out_shape=jax.ShapeDtypeStruct((B, N, C), x.dtype),
        grid_spec=pltpu.PrefetchScalarGridSpec(
            num_scalar_prefetch=0,
            grid=(B,),
            in_specs=[
                pl.BlockSpec((1, N, C), lambda b: (b, 0, 0)),
                # Constant index_map -> fetched once, VMEM-resident; single
                # buffer, no point double-buffering a block that never changes.
                pl.BlockSpec((C, 3 * C), lambda b: (0, 0),
                             pipeline_mode=pl.Buffered(1)),
            ],
            out_specs=pl.BlockSpec((1, N, C), lambda b: (b, 0, 0)),
            scratch_shapes=[pltpu.VMEM((N, 3 * C), compute_dtype)],
        ),
        compiler_params=pltpu.CompilerParams(
            dimension_semantics=("parallel",),
            vmem_limit_bytes=vmem_limit),
        cost_estimate=pl.CostEstimate(
            flops=flops, transcendentals=0, bytes_accessed=bytes_accessed),
    )(x, w_qkv)


def self_attention_ref(x, qkv_weight, num_heads):
    """Pure-JAX reference matching the PyTorch module exactly (f32)."""
    B, N, C = x.shape
    H = num_heads
    d = C // H
    qkv = jnp.einsum("bnc,oc->bno", x, qkv_weight)               # [B, N, 3C]
    qkv = qkv.reshape(B, N, 3, H, d).transpose(2, 0, 3, 1, 4)    # [3, B, H, N, d]
    q, k, v = qkv[0], qkv[1], qkv[2]
    attn = jnp.einsum("bhnd,bhmd->bhnm", q, k)
    out = jnp.einsum("bhnm,bhmd->bhnd", attn, v)
    return out.transpose(0, 2, 1, 3).reshape(B, N, C)


if __name__ == "__main__":
    B, N, C, H = 2, 8, 32, 4   # head_dim d = 8

    key = jax.random.PRNGKey(0)
    kx, kw = jax.random.split(key)
    x = jax.random.normal(kx, (B, N, C), dtype=jnp.float32)
    # PyTorch Linear layout: [out=3C, in=C], no bias.
    qkv_weight = jax.random.normal(kw, (3 * C, C), dtype=jnp.float32) * 0.05

    ref = self_attention_ref(x, qkv_weight, num_heads=H)

    # f32 path (tight-tolerance check).
    w_f32 = prepare_qkv_weight(qkv_weight, dtype=jnp.float32)
    out = self_attention_pallas(x, w_f32, num_heads=H, compute_dtype=jnp.float32)
    out = jax.block_until_ready(out)
    assert out.shape == (B, N, C)
    assert jnp.allclose(out, ref, atol=1e-4, rtol=1e-4), "f32 mismatch vs reference"

    # Default bf16 MXU-input path (f32 accumulation) — looser tolerance since
    # this attention is un-normalized (no softmax / no 1/sqrt(d) scale).
    w_bf16 = prepare_qkv_weight(qkv_weight, dtype=jnp.bfloat16)
    out_bf16 = self_attention_pallas(x, w_bf16, num_heads=H)
    out_bf16 = jax.block_until_ready(out_bf16)
    assert jnp.allclose(out_bf16, ref, atol=5e-2, rtol=5e-2), "bf16 mismatch vs reference"

    print("KERNEL_OK")
</pallas_src>

<mosaic_0001>
module attributes {stable_mosaic.version = 11 : i64} {
  func.func @_self_attn_kernel(%arg0: i32, %arg1: memref<1x8x32xf32, #tpu.memory_space<vmem>>, %arg2: memref<32x96xf32, #tpu.memory_space<vmem>>, %arg3: memref<1x8x32xf32, #tpu.memory_space<vmem>>, %arg4: memref<8x96xf32, #tpu.memory_space<vmem>>) attributes {dimension_semantics = [#tpu.dimension_semantics<parallel>], iteration_bounds = array<i64: 2>, scalar_prefetch = 0 : i64, scratch_operands = 1 : i64, tpu.core_type = #tpu.core_type<tc>, window_params = [{transform_indices = @transform_0, window_bounds = array<i64: 1, 8, 32>}, {pipeline_mode = #tpu.pipeline_mode<synchronous>, transform_indices = @transform_1, window_bounds = array<i64: 32, 96>}, {transform_indices = @transform_2, window_bounds = array<i64: 1, 8, 32>}]} {
    %c0 = arith.constant 0 : index
    %c0_0 = arith.constant 0 : index
    %c0_1 = arith.constant 0 : index
    %0 = vector.load %arg1[%c0, %c0_0, %c0_1] : memref<1x8x32xf32, #tpu.memory_space<vmem>>, vector<1x8x32xf32>
    %1 = vector.shape_cast %0 : vector<1x8x32xf32> to vector<8x32xf32>
    %c0_2 = arith.constant 0 : index
    %c0_3 = arith.constant 0 : index
    %2 = vector.load %arg2[%c0_2, %c0_3] : memref<32x96xf32, #tpu.memory_space<vmem>>, vector<32x96xf32>
    %cst = arith.constant dense<0.000000e+00> : vector<8x96xf32>
    %3 = tpu.matmul %1, %2, %cst {dimension_numbers = #tpu.dot_dimension_numbers<[1], [0], [0], [1], [0, 0, 1, 1], [], []>} : vector<8x32xf32>, vector<32x96xf32>, vector<8x96xf32> -> vector<8x96xf32>
    %c0_4 = arith.constant 0 : index
    %c0_5 = arith.constant 0 : index
    %4 = vector.load %arg4[%c0_4, %c0_5] : memref<8x96xf32, #tpu.memory_space<vmem>>, vector<8x96xf32>
    tpu.vector_store %arg4[%c0_4, %c0_5], %3 {strides = array<i32>} : memref<8x96xf32, #tpu.memory_space<vmem>>, vector<8x96xf32>,
    %c0_6 = arith.constant 0 : index
    %c0_7 = arith.constant 0 : index
    %5 = vector.load %arg4[%c0_6, %c0_7] : memref<8x96xf32, #tpu.memory_space<vmem>>, vector<8x8xf32>
    %c0_8 = arith.constant 0 : index
    %c32 = arith.constant 32 : index
    %6 = vector.load %arg4[%c0_8, %c32] : memref<8x96xf32, #tpu.memory_space<vmem>>, vector<8x8xf32>
    %c0_9 = arith.constant 0 : index
    %c64 = arith.constant 64 : index
    %7 = vector.load %arg4[%c0_9, %c64] : memref<8x96xf32, #tpu.memory_space<vmem>>, vector<8x8xf32>
    %cst_10 = arith.constant dense<0.000000e+00> : vector<8x8xf32>
    %8 = tpu.matmul %5, %6, %cst_10 {dimension_numbers = #tpu.dot_dimension_numbers<[1], [1], [0], [0], [0, 0, 1, 0], [], []>} : vector<8x8xf32>, vector<8x8xf32>, vector<8x8xf32> -> vector<8x8xf32>
    %cst_11 = arith.constant dense<0.000000e+00> : vector<8x8xf32>
    %9 = tpu.matmul %8, %7, %cst_11 {dimension_numbers = #tpu.dot_dimension_numbers<[1], [0], [0], [1], [0, 0, 1, 1], [], []>} : vector<8x8xf32>, vector<8x8xf32>, vector<8x8xf32> -> vector<8x8xf32>
    %c0_12 = arith.constant 0 : index
    %c0_13 = arith.constant 0 : index
    %c0_14 = arith.constant 0 : index
    %10 = vector.load %arg3[%c0_12, %c0_13, %c0_14] : memref<1x8x32xf32, #tpu.memory_space<vmem>>, vector<1x8x8xf32>
    %11 = vector.shape_cast %10 : vector<1x8x8xf32> to vector<8x8xf32>
    %12 = vector.shape_cast %9 : vector<8x8xf32> to vector<1x8x8xf32>
    tpu.vector_store %arg3[%c0_12, %c0_13, %c0_14], %12 {strides = array<i32>} : memref<1x8x32xf32, #tpu.memory_space<vmem>>, vector<1x8x8xf32>,
    %c0_15 = arith.constant 0 : index
    %c8 = arith.constant 8 : index
    %13 = vector.load %arg4[%c0_15, %c8] : memref<8x96xf32, #tpu.memory_space<vmem>>, vector<8x8xf32>
    %c0_16 = arith.constant 0 : index
    %c40 = arith.constant 40 : index
    %14 = vector.load %arg4[%c0_16, %c40] : memref<8x96xf32, #tpu.memory_space<vmem>>, vector<8x8xf32>
    %c0_17 = arith.constant 0 : index
    %c72 = arith.constant 72 : index
    %15 = vector.load %arg4[%c0_17, %c72] : memref<8x96xf32, #tpu.memory_space<vmem>>, vector<8x8xf32>
    %cst_18 = arith.constant dense<0.000000e+00> : vector<8x8xf32>
    %16 = tpu.matmul %13, %14, %cst_18 {dimension_numbers = #tpu.dot_dimension_numbers<[1], [1], [0], [0], [0, 0, 1, 0], [], []>} : vector<8x8xf32>, vector<8x8xf32>, vector<8x8xf32> -> vector<8x8xf32>
    %cst_19 = arith.constant dense<0.000000e+00> : vector<8x8xf32>
    %17 = tpu.matmul %16, %15, %cst_19 {dimension_numbers = #tpu.dot_dimension_numbers<[1], [0], [0], [1], [0, 0, 1, 1], [], []>} : vector<8x8xf32>, vector<8x8xf32>, vector<8x8xf32> -> vector<8x8xf32>
    %c0_20 = arith.constant 0 : index
    %c0_21 = arith.constant 0 : index
    %c8_22 = arith.constant 8 : index
    %18 = vector.load %arg3[%c0_20, %c0_21, %c8_22] : memref<1x8x32xf32, #tpu.memory_space<vmem>>, vector<1x8x8xf32>
    %19 = vector.shape_cast %18 : vector<1x8x8xf32> to vector<8x8xf32>
    %20 = vector.shape_cast %17 : vector<8x8xf32> to vector<1x8x8xf32>
    tpu.vector_store %arg3[%c0_20, %c0_21, %c8_22], %20 {strides = array<i32>} : memref<1x8x32xf32, #tpu.memory_space<vmem>>, vector<1x8x8xf32>,
    %c0_23 = arith.constant 0 : index
    %c16 = arith.constant 16 : index
    %21 = vector.load %arg4[%c0_23, %c16] : memref<8x96xf32, #tpu.memory_space<vmem>>, vector<8x8xf32>
    %c0_24 = arith.constant 0 : index
    %c48 = arith.constant 48 : index
    %22 = vector.load %arg4[%c0_24, %c48] : memref<8x96xf32, #tpu.memory_space<vmem>>, vector<8x8xf32>
    %c0_25 = arith.constant 0 : index
    %c80 = arith.constant 80 : index
    %23 = vector.load %arg4[%c0_25, %c80] : memref<8x96xf32, #tpu.memory_space<vmem>>, vector<8x8xf32>
    %cst_26 = arith.constant dense<0.000000e+00> : vector<8x8xf32>
    %24 = tpu.matmul %21, %22, %cst_26 {dimension_numbers = #tpu.dot_dimension_numbers<[1], [1], [0], [0], [0, 0, 1, 0], [], []>} : vector<8x8xf32>, vector<8x8xf32>, vector<8x8xf32> -> vector<8x8xf32>
    %cst_27 = arith.constant dense<0.000000e+00> : vector<8x8xf32>
    %25 = tpu.matmul %24, %23, %cst_27 {dimension_numbers = #tpu.dot_dimension_numbers<[1], [0], [0], [1], [0, 0, 1, 1], [], []>} : vector<8x8xf32>, vector<8x8xf32>, vector<8x8xf32> -> vector<8x8xf32>
    %c0_28 = arith.constant 0 : index
    %c0_29 = arith.constant 0 : index
    %c16_30 = arith.constant 16 : index
    %26 = vector.load %arg3[%c0_28, %c0_29, %c16_30] : memref<1x8x32xf32, #tpu.memory_space<vmem>>, vector<1x8x8xf32>
    %27 = vector.shape_cast %26 : vector<1x8x8xf32> to vector<8x8xf32>
    %28 = vector.shape_cast %25 : vector<8x8xf32> to vector<1x8x8xf32>
    tpu.vector_store %arg3[%c0_28, %c0_29, %c16_30], %28 {strides = array<i32>} : memref<1x8x32xf32, #tpu.memory_space<vmem>>, vector<1x8x8xf32>,
    %c0_31 = arith.constant 0 : index
    %c24 = arith.constant 24 : index
    %29 = vector.load %arg4[%c0_31, %c24] : memref<8x96xf32, #tpu.memory_space<vmem>>, vector<8x8xf32>
    %c0_32 = arith.constant 0 : index
    %c56 = arith.constant 56 : index
    %30 = vector.load %arg4[%c0_32, %c56] : memref<8x96xf32, #tpu.memory_space<vmem>>, vector<8x8xf32>
    %c0_33 = arith.constant 0 : index
    %c88 = arith.constant 88 : index
    %31 = vector.load %arg4[%c0_33, %c88] : memref<8x96xf32, #tpu.memory_space<vmem>>, vector<8x8xf32>
    %cst_34 = arith.constant dense<0.000000e+00> : vector<8x8xf32>
    %32 = tpu.matmul %29, %30, %cst_34 {dimension_numbers = #tpu.dot_dimension_numbers<[1], [1], [0], [0], [0, 0, 1, 0], [], []>} : vector<8x8xf32>, vector<8x8xf32>, vector<8x8xf32> -> vector<8x8xf32>
    %cst_35 = arith.constant dense<0.000000e+00> : vector<8x8xf32>
    %33 = tpu.matmul %32, %31, %cst_35 {dimension_numbers = #tpu.dot_dimension_numbers<[1], [0], [0], [1], [0, 0, 1, 1], [], []>} : vector<8x8xf32>, vector<8x8xf32>, vector<8x8xf32> -> vector<8x8xf32>
    %c0_36 = arith.constant 0 : index
    %c0_37 = arith.constant 0 : index
    %c24_38 = arith.constant 24 : index
    %34 = vector.load %arg3[%c0_36, %c0_37, %c24_38] : memref<1x8x32xf32, #tpu.memory_space<vmem>>, vector<1x8x8xf32>
    %35 = vector.shape_cast %34 : vector<1x8x8xf32> to vector<8x8xf32>
    %36 = vector.shape_cast %33 : vector<8x8xf32> to vector<1x8x8xf32>
    tpu.vector_store %arg3[%c0_36, %c0_37, %c24_38], %36 {strides = array<i32>} : memref<1x8x32xf32, #tpu.memory_space<vmem>>, vector<1x8x8xf32>,
    return
  }
  func.func @transform_0(%arg0: i32) -> (i32, i32, i32) {
    %c0_i32 = arith.constant 0 : i32
    %c0_i32_0 = arith.constant 0 : i32
    %c0_i32_1 = arith.constant 0 : i32
    return %arg0, %c0_i32, %c0_i32_0 : i32, i32, i32
  }
  func.func @transform_1(%arg0: i32) -> (i32, i32) {
    %c0_i32 = arith.constant 0 : i32
    %c0_i32_0 = arith.constant 0 : i32
    %c0_i32_1 = arith.constant 0 : i32
    return %c0_i32, %c0_i32_0 : i32, i32
  }
  func.func @transform_2(%arg0: i32) -> (i32, i32, i32) {
    %c0_i32 = arith.constant 0 : i32
    %c0_i32_0 = arith.constant 0 : i32
    %c0_i32_1 = arith.constant 0 : i32
    return %arg0, %c0_i32, %c0_i32_0 : i32, i32, i32
  }
}

</mosaic_0001>

<bundles_post_ra>
// kernel: tpu_custom_call.1
= control target key start
LH: loop header
LB: loop body
LE: loop exit
PB: predicated region body
PF: predicated region fallthrough
CT: control target
= control target key end

     0   :  { %7 = vsyncpa [#allocation4], 0  ;;  %s1578_s0 = inlined_call_operand.hbm [shape: f32[2,8,32], index: 0, kind: input, shape index: {}]   ;;  %s1579_s1 = inlined_call_operand.hbm [shape: f32[32,96], index: 1, kind: input, shape index: {}]   ;;  %s1580_s2 = inlined_call_operand.hbm [shape: f32[2,8,32], index: 2, kind: output, shape index: {}]  }
   0x1   :  { %9 = vsyncpa [#allocation4 + $0x1], 0 }
   0x2   :  { %10 = vsyncpa [#allocation7], 0 }
   0x3   :  { %11 = vsyncpa [#allocation5], 0 }
   0x4   :  { %13 = vsyncpa [#allocation5 + $0x1], 0  ;;  %s1339_s9 = smov 0   ;;  %s1341_s10 = smov 0  }
   0x5   :  { %s1343_s11 = smov 0   ;;  %s1345_s12 = smov 0  }
   0x6 LB: > { %s1360_s13 = sadd.s32 4294967295, %s1300_s12   ;;  %s991_s14 = sadd.s32 4294967294, %s1300_s12   ;;  %s1300_s12 = sphi %s1345_s12, %s1600_s12   ;;  %s1296_s11 = sphi %s1343_s11, %s1599_s11   ;;  %s1292_s10 = sphi %s1341_s10, %s1598_s10   ;;  %s1288_s9 = sphi %s1339_s9, %s1597_s9  }
   0x7   : > { %p39_p0 = scmp.ne.s32.totalorder %s1292_s10, %s1288_s9  ;;  %p1581_p1 = scmp.eq.s32.totalorder %s1360_s13, 0 }
   0x8   : > { %p90_p3 = scmp.eq.s32.totalorder %s991_s14, 1  ;;  %p992_p5 = scmp.ge.s32.totalorder %s1300_s12, 1 }
   0x9   : > { %p1369_p4 = por %p1581_p1, %p39_p0  ;;  %p97_p7 = scmp.lt.s32.totalorder %s1300_s12, 3 }
   0xa   : > { %p1374_p6 = por %p90_p3, %p39_p0  ;;  %s1302_s18 = smov [#allocation6]  }
   0xb   : > { %s1584_s15 = scalar_select %p1369_p4, 1, 0 }
   0xc   : > { %s1585_s16 = scalar_select %p1374_p6, 1, 0 }
   0xd   : > { %p1379_p8 = pnand %p992_p5, %p97_p7  ;;  %s109_s19 = sshll.u32 %s1302_s18, 4  ;;  %s1383_s19 = int_to_ptr.vmem [resolvable:$true] %s109_s19 }
   0xe   : > { %s1395_s21 = sadd.s32 1, %s1300_s12   ;;  %s26_s22 = sadd.s32 1, %s1296_s11 }
   0xf   : > { %s1586_s17 = scalar_select %p1379_p8, 1, 0 }
  0x10   : > { %p1104_p9 = pneg %p1379_p8  ;;  %s23_s23 = ssub.s32 %s1300_s12, %s1395_s21 }
  0x11   : > { %s1172_s26 = scalar_lea.hbm %s1579_s1, 512 }
  0x12   : > { %p1390_p11 = pnand %p1104_p9, %p1581_p1  ;;  %p1173_p12 = scmp.ne.s32.totalorder %s1579_s1, %s1172_s26 }
  0x13   : > { %p1179_p5 = scmp.lt.u32.totalorder %s1172_s26, %s1579_s1 }
  0x14   : > { %p1174_p13 = pneg %p1390_p11 }
  0x16   : > { %p1175_p0 = pnand %p1174_p13, %p1173_p12 }
  0x18   : > { %p1176_p3 = pneg %p1175_p0 }
  0x1a   : > { %p1181_p7 = pnand %p1179_p5, %p1176_p3 }
  0x1c   : > { %1184 = shalt.err (!%p1181_p7)
}
  0x1d   : > { %s1185_s3 = scalar_lea.vmem %s1383_s19, 512  ;;  %p1193_p2 = scmp.lt.s32.totalorder %s1383_s19, %s1383_s19 }
  0x1e   : > { %p1186_p9 = scmp.ne.s32.totalorder %s1383_s19, %s1185_s3  ;;  %p1194_p6 = scmp.lt.s32.totalorder %s1185_s3, %s1185_s3 }
  0x20   : > { %p1188_p10 = pnand %p1186_p9, %p1174_p13  ;;  %p1195_p4 = por %p1194_p6, %p1193_p2 }
  0x22   : > { %p1189_p1 = pneg %p1188_p10 }
  0x24   : > { %p1196_p8 = pnand %p1195_p4, %p1189_p1 }
  0x26   : > { %1199 = shalt.err (!%p1196_p8)
}
  0x27   : > { %s1303_s4 = smov 128   ;;  %s1304_s5 = smov 8  }
  0x28   : > { %1107 = dma.hbm_to_vmem [thread:$0]  (!%p1390_p11), %s1579_s1, 512, %s1383_s19, [#allocation7], %s1303_s4, %s1303_s4, %s1304_s5  }
  0x29   : > { %p24_p2 = scmp.eq.s32.totalorder %s23_s23, 0  ;;  %p33_p1 = scmp.ne.s32.totalorder %s1296_s11, %s1292_s10 }
  0x2a   : > { %p34_p4 = scmp.eq.s32.totalorder %s1300_s12, 0  ;;  %p1117_p6 = scmp.lt.s32.totalorder %s1300_s12, 2 }
  0x2b   : > { %s1426_s8 = scalar_select %p24_p2, %s1296_s11, %s26_s22  }
  0x2c   : > { %p35_p8 = por %p34_p4, %p33_p1  ;;  %p1588_p10 = scmp.eq.s32.totalorder %s1360_s13, 1 }
  0x2d   : > { %s123_s18 = sand.u32 1, %s1296_s11   ;;  %s996_s24 = sshll.u32 %s1300_s12, 7 }
  0x2e   : > { %p1430_p12 = por %p1588_p10, %p33_p1  ;;  %s995_s25 = sshll.u32 %s123_s18, 3 }
  0x2f   : > { %s1439_s27 = scalar_lea.hbm %s1578_s0, %s996_s24  ;;  %s127_s19 = scalar_lea.vmem [#allocation3], %s995_s25 }
  0x30   : > { %s134_s22 = sshll.u32 %s127_s19, 4  ;;  %p1441_p11 = pnand %p1117_p6, %p35_p8  ;;  %s1445_s22 = int_to_ptr.vmem [resolvable:$true] %s134_s22 }
  0x31   : > { %s124_s28 = scalar_lea.sflag [#allocation4], %s123_s18  ;;  %s1200_s29 = scalar_lea.hbm %s1439_s27, 128 }
  0x32   : > { %p1201_p13 = scmp.ne.s32.totalorder %s1439_s27, %s1200_s29  ;;  %p1202_p0 = pneg %p1441_p11 }
  0x33   : > { %s1205_s4 = scalar_lea.hbm %s1578_s0, 256  ;;  %p1206_p7 = scmp.lt.u32.totalorder %s1439_s27, %s1578_s0 }
  0x34   : > { %p1203_p3 = pnand %p1202_p0, %p1201_p13  ;;  %p1207_p9 = scmp.lt.u32.totalorder %s1205_s4, %s1200_s29 }
  0x35   : > { %p1209_p1 = scmp.lt.u32.totalorder %s1200_s29, %s1439_s27 }
  0x36   : > { %p1204_p5 = pneg %p1203_p3  ;;  %p1208_p2 = por %p1207_p9, %p1206_p7 }
  0x38   : > { %p1210_p4 = por %p1209_p1, %p1208_p2 }
  0x3a   : > { %p1211_p6 = pnand %p1210_p4, %p1204_p5 }
  0x3c   : > { %1214 = shalt.err (!%p1211_p6)
}
  0x3d   : > { %s1215_s7 = scalar_lea.vmem %s1445_s22, 128  ;;  %s1305_s18 = smov [#allocation3]  }
  0x3e   : > { %p1216_p8 = scmp.ne.s32.totalorder %s1445_s22, %s1215_s7  ;;  %s1220_s24 = sshll.u32 %s1305_s18, 4  ;;  %s1221_s24 = int_to_ptr.vmem [resolvable:$false] %s1220_s24 }
  0x3f   : > { %s1222_s25 = scalar_lea.vmem %s1221_s24, 256  ;;  %p1223_p3 = scmp.lt.s32.totalorder %s1445_s22, %s1221_s24 }
  0x40   : > { %p1218_p10 = pnand %p1216_p8, %p1202_p0  ;;  %p1224_p7 = scmp.lt.s32.totalorder %s1222_s25, %s1215_s7 }
  0x42   : > { %p1219_p13 = pneg %p1218_p10  ;;  %p1225_p9 = por %p1224_p7, %p1223_p3 }
  0x44   : > { %p1226_p2 = pnand %p1225_p9, %p1219_p13 }
  0x46   : > { %1229 = shalt.err (!%p1226_p2)
}
  0x47   : > { %1111 = dma.hbm_to_vmem [thread:$0]  (!%p1441_p11), %s1439_s27, 128, %s1445_s22, %s124_s28  }
  0x48   : > { %p1591_p5 = scmp.ne.s32.totalorder %s1586_s17, 0 }
  0x49   : > { %s1475_s20 = sand.u32 (!%p1591_p5), 1, %s1292_s10   ;;  %p1592_p0 = scmp.ne.s32.totalorder (!%p1591_p5), %s1584_s15, 0 }
  0x4a   : > { %143 = sbr.rel (%p1591_p5) target bundleno = 998 (0x3e6), region = 28  ;;  %s998_s26 = sshll.u32 (!%p1591_p5), %s1475_s20, 3 }
  0x4b   : > { %s146_s19 = scalar_lea.sflag (!%p1591_p5), [#allocation4], %s1475_s20  ;;  %s149_s29 = scalar_lea.vmem (!%p1591_p5), [#allocation3], %s998_s26 }
  0x51   : > { %1275 = dma.done.wait (%p1592_p0), %s146_s19, 128  }
  0x52   : > { %1277 = vsyncadd (%p1592_p0), %s146_s19, 4294967168  ;;  %p1593_p11 = scmp.eq.s32.totalorder %s1360_s13, 0 }
  0x54   : > { %1279 = dma.done.wait (%p1593_p11), [#allocation7], 512   ;;  %p1594_p1 = pmov %p1593_p11 }
  0x55   : > { %v1306_v0 = vmov 0.0|0.0   ;;  %vm1307_vm0 = vmmov 0   ;;  %v1308_v1 = vmov 0.0   ;;  %v175_v2 = vld [vmem:[#allocation6] sm:$0xff]  ;;  %v176_v3 = vld [vmem:[#allocation6 + $0x8] sm:$0xff]  ;;  %v177_v4 = vld [vmem:[#allocation6 + $0x10] sm:$0xff] }
  0x56   : > { %1281 = vsyncadd (%p1594_p1), [#allocation7], 4294966784  ;;  %1090 = vmatprep.subr.bf16.mxu0 %v1306_v0  ;;  %1047 = vmatprep.mubr.msk.f32.mxu0 %vm1307_vm0, %v1308_v1  ;;  %v1091_v5 = vpack.c.bf16 %v176_v3, %v175_v2  ;;  %v178_v6 = vld [vmem:[#allocation6 + $0x18] sm:$0xff]  ;;  %vm179_vm1 = vcmask 261120   ;;  %vm253_vm2 = vcmask 785408   ;;  %s1309_s15 = smov 120  }
  0x57   : > { %1050 = vmatprep.subr.mxu1 %v1308_v1  ;;  %1052 = vmatprep.mubr.msk.f32.mxu1 %vm1307_vm0, %v1308_v1  ;;  %v1094_v7 = vpack.c.bf16 %v178_v6, %v177_v4  ;;  %v174_v8 = vld [vmem:[%s149_s29] sm:$0xff]  ;;  %s1310_s17 = smov 96   ;;  %s1311_s27 = smov 80   ;;  %vm259_vm3 = vcmask 64512   ;;  %vm571_vm4 = vcmask 130112   ;;  %vm733_vm5 = vcmask 195712  }
  0x58   : > { %1092 = vmatpush3.bf16.msra.mxu0 %v1091_v5  ;;  %s1312_s22 = smov 88   ;;  %s1313_s23 = smov 72   ;;  %vm895_vm6 = vcmask 261312  }
  0x59   : > { %1093 = vmatprep.subr.bf16.mxu0 %v1306_v0  ;;  %s1314_s28 = smov 112   ;;  %s1315_s30 = smov 64  }
  0x5a   : > { %s1316_s3 = smov 104   ;;  %s1317_s4 = smov 48  }
  0x5b   : > { %s1318_s5 = smov 56   ;;  %s1319_s6 = smov 40  }
  0x5c   : > { %1095 = vmatpush3.bf16.msra.mxu0 %v1094_v7  ;;  %s173_s7 = scalar_lea.vmem [#allocation8], %s998_s26  ;;  %s1320_s18 = smov 8  }
  0x5d   : > { %1060 = vmatprep.subr.mxu0 %v1308_v1  ;;  %s1321_s24 = smov 16   ;;  %s1322_s25 = smov 24  }
  0x5e   : > { %s1015_s26 = sshll.u32 %s1360_s13, 7  ;;  %s911_s19 = sshll.u32 %s173_s7, 4  ;;  %s1536_s19 = int_to_ptr.vmem [resolvable:$true] %s911_s19 }
  0x5f   : > { %1048 = vmatmul.mubr.msk.f32.vlgmr.msra.gmra.mrb[0].mxu0 %vm179_vm1, %v174_v8  ;;  %s1323_s13 = smov [#allocation8]  }
  0x60   : > { %1062 = vmatprep.mubr.msk.f32.mxu0 %vm1307_vm0, %v1308_v1 }
 0x132   : > { %v249_v9 = vpop.f32.mrb[0].mxu0 }
 0x133   : > { %254 = vst.msk [vmem:[#allocation2] sm:$0xff] %vm253_vm2, %v249_v9  ;;  %v1049_v10 = vpop.f32.mrb[1].mxu0 }
 0x13a   : > { %v411_v11 = vld [vmem:[#allocation2] sm:$0xff] }
 0x13b   : > { %413 = vrot.lane.b32.xlu1 %v411_v11, %s1309_s15  ;;  %257 = vrot.lane.b32.xlu0 %v411_v11, %s1310_s17  ;;  %s1534_s17 = scalar_lea.hbm %s1580_s2, %s1015_s26 }
 0x13f   : > { %577 = vrot.lane.b32.xlu1 %v411_v11, %s1311_s27  ;;  %415 = vrot.lane.b32.xlu0 %v411_v11, %s1312_s22  ;;  %s898_s27 = scalar_lea.sflag [#allocation5], %s1475_s20  ;;  %s1230_s22 = scalar_lea.vmem %s1536_s19, 128 }
 0x140   : > { %p1231_p4 = scmp.ne.s32.totalorder %s1536_s19, %s1230_s22 }
 0x142   : > { %p1232_p6 = pnand %p1231_p4, %p1430_p12 }
 0x143   : > { %739 = vrot.lane.b32.xlu1 %v411_v11, %s1313_s23  ;;  %575 = vrot.lane.b32.xlu0 %v411_v11, %s1314_s28  ;;  %s1234_s23 = sshll.u32 %s1323_s13, 4  ;;  %s1235_s23 = int_to_ptr.vmem [resolvable:$false] %s1234_s23 }
 0x144   : > { %p1233_p8 = pneg %p1232_p6  ;;  %s1236_s28 = scalar_lea.vmem %s1235_s23, 256 }
 0x145   : > { %p1237_p10 = scmp.lt.s32.totalorder %s1536_s19, %s1235_s23  ;;  %p1238_p13 = scmp.lt.s32.totalorder %s1236_s28, %s1230_s22 }
 0x147   : > { %334 = vrot.lane.b32.xlu1 %v411_v11, %s1315_s30  ;;  %737 = vrot.lane.b32.xlu0 %v411_v11, %s1316_s3  ;;  %p1239_p3 = por %p1238_p13, %p1237_p10 }
 0x149   : > { %p1240_p7 = pnand %p1239_p3, %p1233_p8 }
 0x14b   : > { %653 = vrot.lane.b32.xlu1 %v411_v11, %s1317_s4  ;;  %491 = vrot.lane.b32.xlu0 %v411_v11, %s1318_s5 }
 0x14f   : > { %815 = vrot.lane.b32.xlu0 %v411_v11, %s1319_s6 }
 0x1ad   : > { %v414_v12 = vpop.permute.xlu1 %413  ;;  %v258_v13 = vpop.permute.xlu0 %257 }
 0x1ae   : > { %1051 = vmatpush3.xpose.msk.msra.mxu1 %vm259_vm3, %v258_v13 }
 0x1af   : > { %1055 = vmatprep.subr.mxu1 %v1308_v1 }
 0x1b1   : > { %v578_v14 = vpop.permute.xlu1 %577  ;;  %1053 = vmatmul.mubr.msk.f32.vlgmr.msra.gmra.mrb[0].mxu1 %vm259_vm3, %v411_v11  ;;  %v416_v15 = vpop.permute.xlu0 %415 }
 0x1b2   : > { %1061 = vmatpush3.xpose.msk.msra.mxu0 %vm259_vm3, %v416_v15  ;;  %1057 = vmatprep.mubr.msk.f32.mxu1 %vm1307_vm0, %v1308_v1 }
 0x1b3   : > { %1070 = vmatprep.subr.mxu0 %v1308_v1 }
 0x1b5   : > { %v740_v16 = vpop.permute.xlu1 %739  ;;  %1063 = vmatmul.mubr.msk.f32.vlgmr.msra.gmra.mrb[2].mxu0 %vm259_vm3, %v414_v12  ;;  %v576_v17 = vpop.permute.xlu0 %575 }
 0x1b6   : > { %1071 = vmatpush3.xpose.msk.msra.mxu0 %vm259_vm3, %v578_v14  ;;  %1072 = vmatprep.mubr.msk.f32.mxu0 %vm1307_vm0, %v1308_v1 }
 0x1b7   : > { %1080 = vmatprep.subr.mxu0 %v1308_v1 }
 0x1b9   : > { %v335_v18 = vpop.permute.xlu1 %334  ;;  %1073 = vmatmul.mubr.msk.f32.vlgmr.msra.gmra.mrb[4].mxu0 %vm259_vm3, %v576_v17  ;;  %v738_v19 = vpop.permute.xlu0 %737 }
 0x1ba   : > { %1056 = vmatpush3.msra.mxu1 %v335_v18  ;;  %1081 = vmatpush3.xpose.msk.msra.mxu0 %vm259_vm3, %v740_v16 }
 0x1bb   : > { %1082 = vmatprep.mubr.msk.f32.mxu0 %vm1307_vm0, %v1308_v1  ;;  %1065 = vmatprep.subr.mxu1 %v1308_v1 }
 0x1bd   : > { %1083 = vmatmul.mubr.msk.f32.vlgmr.msra.gmra.mrb[6].mxu0 %vm259_vm3, %v738_v19  ;;  %v492_v21 = vpop.permute.xlu0 %491  ;;  %v654_v24 = vpop.permute.xlu1 %653 }
 0x1c1   : > { %v816_v27 = vpop.permute.xlu0 %815 }
 0x284   : > { %v330_v20 = vpop.f32.mrb[0].mxu1 }
 0x285   : > { %v1054_v22 = vpop.f32.mrb[1].mxu1  ;;  %1058 = vmatmul.mubr.msk.f32.vlgmr.msra.gmra.mrb[2].mxu1 %vm259_vm3, %v330_v20 }
 0x286   : > { %1066 = vmatpush3.msra.mxu1 %v492_v21  ;;  %1067 = vmatprep.mubr.msk.f32.mxu1 %vm1307_vm0, %v1308_v1 }
 0x287   : > { %1075 = vmatprep.subr.mxu1 %v1308_v1 }
 0x288   : > { %v487_v23 = vpop.f32.mrb[2].mxu0 }
 0x289   : > { %v1064_v25 = vpop.f32.mrb[3].mxu0  ;;  %1068 = vmatmul.mubr.msk.f32.vlgmr.msra.gmra.mrb[4].mxu1 %vm259_vm3, %v487_v23 }
 0x28a   : > { %1076 = vmatpush3.msra.mxu1 %v654_v24  ;;  %1077 = vmatprep.mubr.msk.f32.mxu1 %vm1307_vm0, %v1308_v1 }
 0x28b   : > { %1085 = vmatprep.subr.mxu1 %v1308_v1 }
 0x28c   : > { %v649_v26 = vpop.f32.mrb[4].mxu0 }
 0x28d   : > { %v1074_v28 = vpop.f32.mrb[5].mxu0  ;;  %1078 = vmatmul.mubr.msk.f32.vlgmr.msra.gmra.mrb[6].mxu1 %vm259_vm3, %v649_v26 }
 0x28e   : > { %1086 = vmatpush3.msra.mxu1 %v816_v27  ;;  %1087 = vmatprep.mubr.msk.f32.mxu1 %vm1307_vm0, %v1308_v1 }
 0x290   : > { %v811_v29 = vpop.f32.mrb[6].mxu0 }
 0x291   : > { %v1084_v30 = vpop.f32.mrb[7].mxu0  ;;  %1088 = vmatmul.mubr.msk.f32.vlgmr.msra.gmra.mrb[8].mxu1 %vm259_vm3, %v811_v29 }
 0x358   : > { %v406_v31 = vpop.f32.mrb[2].mxu1 }
 0x359   : > { %410 = vst.msk [vmem:[%s173_s7] sm:$0xff] %vm259_vm3, %v406_v31  ;;  %v1059_v32 = vpop.f32.mrb[3].mxu1 }
 0x35c   : > { %v563_v33 = vpop.f32.mrb[4].mxu1 }
 0x35d   : > { %568 = vrot.lane.b32.xlu1 %v563_v33, %s1320_s18  ;;  %v1069_v34 = vpop.f32.mrb[5].mxu1 }
 0x360   : > { %v725_v35 = vpop.f32.mrb[6].mxu1 }
 0x361   : > { %730 = vrot.lane.b32.xlu0 %v725_v35, %s1321_s24  ;;  %v1079_v36 = vpop.f32.mrb[7].mxu1 }
 0x364   : > { %v887_v37 = vpop.f32.mrb[8].mxu1 }
 0x365   : > { %892 = vrot.lane.b32.xlu1 %v887_v37, %s1322_s25  ;;  %v1089_v38 = vpop.f32.mrb[9].mxu1 }
 0x3cf   : > { %v569_v39 = vpop.permute.xlu1 %568 }
 0x3d0   : > { %572 = vst.msk [vmem:[%s173_s7] sm:$0xff] %vm571_vm4, %v569_v39 }
 0x3d3   : > { %v731_v40 = vpop.permute.xlu0 %730 }
 0x3d4   : > { %734 = vst.msk [vmem:[%s173_s7] sm:$0xff] %vm733_vm5, %v731_v40 }
 0x3d7   : > { %v893_v41 = vpop.permute.xlu1 %892 }
 0x3d8   : > { %896 = vst.msk [vmem:[%s173_s7] sm:$0xff] %vm895_vm6, %v893_v41 }
 0x3d9   : > { %1243 = shalt.err (!%p1240_p7)
}
 0x3da   : > { %s1244_s20 = scalar_lea.hbm %s1534_s17, 128  ;;  %s1248_s4 = scalar_lea.hbm %s1580_s2, 256 }
 0x3db   : > { %p1245_p9 = scmp.ne.s32.totalorder %s1534_s17, %s1244_s20  ;;  %p1249_p0 = scmp.lt.u32.totalorder %s1534_s17, %s1580_s2 }
 0x3dc   : > { %p1250_p11 = scmp.lt.u32.totalorder %s1248_s4, %s1244_s20  ;;  %p1252_p4 = scmp.lt.u32.totalorder %s1244_s20, %s1534_s17 }
 0x3dd   : > { %p1246_p2 = pnand %p1245_p9, %p1430_p12 }
 0x3de   : > { %p1251_p1 = por %p1250_p11, %p1249_p0 }
 0x3df   : > { %p1247_p5 = pneg %p1246_p2 }
 0x3e0   : > { %p1253_p6 = por %p1252_p4, %p1251_p1 }
 0x3e2   : > { %p1254_p8 = pnand %p1253_p6, %p1247_p5 }
 0x3e4   : > { %1257 = shalt.err (!%p1254_p8)
}
 0x3e5   : > { %1102 = dma.vmem_to_hbm [thread:$0]  (%p1430_p12), %s1536_s19, 128, %s1534_s17, %s898_s27  }
 0x3e6 PF: > { %s923_s7 = sand.u32 1, %s1288_s9   ;;  %p1595_p10 = scmp.ne.s32.totalorder %s1585_s16, 0 }
 0x3e7   : > { %p1596_p13 = scmp.ge.s32.totalorder %s1300_s12, 2  ;;  %s924_s18 = scalar_lea.sflag [#allocation5], %s923_s7 }
 0x3e9   : > { %p1113_p3 = pnand %p1596_p13, %p1595_p10 }
 0x3eb   : > { %1283 = dma.done.wait (!%p1113_p3), %s924_s18, 128  }
 0x3ec   : > { %1285 = vsyncadd (!%p1113_p3), %s924_s18, 4294967168  ;;  %p16_p7 = scmp.ge.s32.totalorder %s1395_s21, 4   ;;  %s1597_s9 = smov %s1292_s10 }
 0x3ed   : > { %s1598_s10 = smov %s1296_s11  ;;  %s1599_s11 = smov %s1426_s8 }
 0x3ee   : > { %s1600_s12 = smov %s1395_s21  ;;  %18 = sbr.rel (!%p16_p7) target bundleno = 6 (0x6), region = 77 }
 0x3f5   :  { %929 = vsyncpa [#allocation4], 1 }
 0x3f6   :  { %931 = vsyncpa [#allocation4 + $0x1], 1 }
 0x3f7   :  { %932 = vsyncpa [#allocation7], 1 }
 0x3f8   :  { %933 = vsyncpa [#allocation5], 1 }
 0x3f9   :  { %935 = vsyncpa [#allocation5 + $0x1], 1 }

</bundles_post_ra>
